<compile_context>
chip_gen: v6e
topology: v6e:2x2x1
jax: 0.10.0
libtpu: 0.0.40
codegen_flags: <defaults>
</compile_context>

<pallas_src>
import functools

import jax
import jax.numpy as jnp
from jax.experimental import pallas as pl
from jax.experimental.pallas import tpu as pltpu

LANES = 128  # hidden activations are padded to one full vreg lane width


def _round_up(n, m):
    return ((n + m - 1) // m) * m


def mlp_kernel(x_ref, w1_ref, w23_ref, o_ref):
    # x_ref  : (tb, xw)        bf16 -- lanes [0:din) = state, lane din = constant 1 (bias lane)
    # w1_ref : (xw, 128)       bf16 -- augmented W1: row din = b1, [din, 127] = 1.0 (ones hop)
    # w23_ref: (2, 128, 128)   bf16 -- augmented W2, W3 (biases folded into row 127)
    # o_ref  : (tb//128, 128)  f32  -- compacted lane-dense sigmoid outputs

    # fc1 + ReLU (bias comes from the constant-1 input lane; padded hidden lanes stay 0,
    # lane 127 carries the constant 1 forward so fc2/fc3 biases work the same way)
    h1 = jnp.maximum(
        jnp.dot(x_ref[...], w1_ref[...], preferred_element_type=jnp.float32), 0.0)

    # fc2 + ReLU
    h2 = jnp.maximum(
        jnp.dot(h1.astype(jnp.bfloat16), w23_ref[0],
                preferred_element_type=jnp.float32), 0.0)

    # fc3: only column 0 of W3 is populated, so only lane 0 of z is real
    z = jnp.dot(h2.astype(jnp.bfloat16), w23_ref[1],
                preferred_element_type=jnp.float32)            # (tb, 128)

    # Output compaction: per-128-row block, transpose on the XLU and take the real column,
    # giving lane-dense (nb, 128) rows.  Sigmoid runs on 128x fewer elements.
    tb = z.shape[0]
    nb = tb // 128
    zt = jnp.transpose(z.reshape(nb, 128, 128), (0, 2, 1))     # nb XLU 128x128 transposes
    col = zt[:, 0, :]                                          # (nb, 128) real fc3 outputs
    o_ref[...] = (1.0 / (1.0 + jnp.exp(-col))).astype(o_ref.dtype)   # exact sigmoid


def pack_params(params, dtype=jnp.bfloat16):
    """Fold biases into augmented bf16 weights.

    Returns (w1_aug, w23_packed):
      w1_aug     : (xw, 128) with xw = round_up(din+1, 8); row `din` = b1, [din, 127] = 1.0
                   so the constant-1 bias lane of x propagates to lane 127 of h1 (ReLU(1)=1).
      w23_packed : (2, 128, 128); W2 has b2 in row 127 and a 1.0 at [127,127]; W3 has w3/b3
                   only in column 0 (only lane 0 of z is consumed).
    """
    w1, b1, w2, b2, w3, b3 = params          # weights stored as [in, out]
    din, hid = w1.shape
    assert hid <= LANES - 1, "hidden_dim must leave lane 127 free for the bias lane"
    xw = _round_up(din + 1, 8)
    assert xw <= LANES
    one_in = din          # constant-1 lane index in the compact input
    one = LANES - 1       # constant-1 lane index in the 128-wide hidden activations

    W1 = jnp.zeros((xw, LANES), jnp.float32)
    W1 = W1.at[:din, :hid].set(w1)
    W1 = W1.at[one_in, :hid].set(b1.reshape(-1))
    W1 = W1.at[one_in, one].set(1.0)                       # ones-lane hop into h1[:, 127]

    W2 = jnp.zeros((LANES, LANES), jnp.float32)
    W2 = W2.at[:hid, :hid].set(w2).at[one, :hid].set(b2.reshape(-1)).at[one, one].set(1.0)

    W3 = jnp.zeros((LANES, LANES), jnp.float32)
    W3 = W3.at[:hid, 0].set(w3.reshape(-1)).at[one, 0].set(b3.reshape(-1)[0])

    return W1.astype(dtype), jnp.stack([W2, W3]).astype(dtype)


@functools.partial(jax.jit, static_argnames=("tile_b",))
def mlp_forward(x, w1_aug, w23, *, tile_b=1024):
    """x: (B, input_dim) f32; (w1_aug, w23) from pack_params. Returns (B, 1) f32 probabilities."""
    B, din = x.shape
    xw = w1_aug.shape[0]
    assert din < xw <= LANES, "input_dim must match the packed params (bias lane at index din)"

    # Batch tiling: single full tile for small batches; 1024-row tiles (>=2 parallel grid
    # steps, v7x megacore) for big ones.  tb must be a multiple of 128 for output compaction,
    # and a multiple of 1024 when the grid has >1 step so the (tb//128, 128) output block
    # stays (8k, 128)-aligned.
    b128 = _round_up(B, 128)
    if b128 <= tile_b:
        tb = b128
    else:
        tb = max(1024, (tile_b // 1024) * 1024)
    b_pad = _round_up(b128, tb)

    # Wrapper-side layout plumbing: narrow bf16 input with an appended constant-1 bias lane.
    x_aug = jnp.zeros((b_pad, xw), jnp.bfloat16)
    x_aug = x_aug.at[:B, :din].set(x.astype(jnp.bfloat16))
    x_aug = x_aug.at[:, din].set(1.0)

    out = pl.pallas_call(
        mlp_kernel,
        out_shape=jax.ShapeDtypeStruct((b_pad // 128, LANES), jnp.float32),
        grid=(b_pad // tb,),
        in_specs=[
            pl.BlockSpec((tb, xw), lambda i: (i, 0)),                 # x tile, pipelined
            pl.BlockSpec((xw, LANES), lambda i: (0, 0)),              # augmented W1, resident
            pl.BlockSpec((2, LANES, LANES), lambda i: (0, 0, 0)),     # packed W2/W3, resident
        ],
        out_specs=pl.BlockSpec((tb // 128, LANES), lambda i: (i, 0)),  # compacted lane-dense out
        compiler_params=pltpu.CompilerParams(
            dimension_semantics=("parallel",),
        ),
    )(x_aug, w1_aug, w23)

    # Padded rows compute garbage (sliced off here); padded output lanes were never written
    # with real data either since only lane 0 of z was gathered.
    return out.reshape(-1)[:B].reshape(B, 1)


def init_params(key, input_dim, hidden_dim=36):
    """Deterministic init mimicking torch.nn.Linear default (U[-1/sqrt(fan_in), 1/sqrt(fan_in)])."""
    def linear(k, fan_in, fan_out):
        kw, kb = jax.random.split(k)
        bound = 1.0 / jnp.sqrt(jnp.float32(fan_in))
        # stored as [in, out] so the kernel computes x @ W (== PyTorch x @ W.T)
        w = jax.random.uniform(kw, (fan_in, fan_out), jnp.float32, -bound, bound)
        b = jax.random.uniform(kb, (fan_out,), jnp.float32, -bound, bound)
        return w, b

    k1, k2, k3 = jax.random.split(key, 3)
    w1, b1 = linear(k1, input_dim, hidden_dim)
    w2, b2 = linear(k2, hidden_dim, hidden_dim)
    w3, b3 = linear(k3, hidden_dim, 1)
    return (w1, b1, w2, b2, w3, b3)


if __name__ == "__main__":
    key = jax.random.PRNGKey(0)
    k_param, k_x, k_xb = jax.random.split(key, 3)

    batch, input_dim, hidden_dim = 8, 4, 36   # e.g. CartPole state dim = 4
    params = init_params(k_param, input_dim, hidden_dim)
    w1_aug, w23 = pack_params(params)
    w1, b1, w2, b2, w3, b3 = params

    def ref_f32(xx):
        return jax.nn.sigmoid(
            jnp.maximum(jnp.maximum(xx @ w1 + b1, 0.0) @ w2 + b2, 0.0) @ w3 + b3)

    def ref_bf16(xx):  # same bf16-input / f32-accumulate matmul precision as the kernel
        bf = lambda a: a.astype(jnp.bfloat16)
        rt = lambda a: a.astype(jnp.bfloat16).astype(jnp.float32)
        h1 = jnp.maximum(jnp.dot(bf(xx), bf(w1), preferred_element_type=jnp.float32) + rt(b1), 0.0)
        h2 = jnp.maximum(jnp.dot(bf(h1), bf(w2), preferred_element_type=jnp.float32) + rt(b2), 0.0)
        return jax.nn.sigmoid(
            jnp.dot(bf(h2), bf(w3), preferred_element_type=jnp.float32) + rt(b3))

    # Small batch (single grid step, demo-sized).
    x = jax.random.normal(k_x, (batch, input_dim), jnp.float32)
    out = jax.block_until_ready(mlp_forward(x, w1_aug, w23))
    assert out.shape == (batch, 1)
    err_bf = float(jnp.max(jnp.abs(out - ref_bf16(x))))
    err_f32 = float(jnp.max(jnp.abs(out - ref_f32(x))))
    assert jnp.allclose(out, ref_bf16(x), atol=1e-2, rtol=1e-2), f"max err vs bf16 ref: {err_bf}"
    assert jnp.allclose(out, ref_f32(x), atol=5e-2, rtol=5e-2), f"max err vs f32 ref: {err_f32}"

    # Larger batch: exercises multi-step "parallel" grid, batch padding and output compaction.
    xb = jax.random.normal(k_xb, (2500, input_dim), jnp.float32)
    outb = jax.block_until_ready(mlp_forward(xb, w1_aug, w23))
    assert outb.shape == (2500, 1)
    err_bf_b = float(jnp.max(jnp.abs(outb - ref_bf16(xb))))
    err_f32_b = float(jnp.max(jnp.abs(outb - ref_f32(xb))))
    assert jnp.allclose(outb, ref_bf16(xb), atol=1e-2, rtol=1e-2), f"max err vs bf16 ref: {err_bf_b}"
    assert jnp.allclose(outb, ref_f32(xb), atol=5e-2, rtol=5e-2), f"max err vs f32 ref: {err_f32_b}"

    print("KERNEL_OK")
</pallas_src>

<mosaic_0001>
module attributes {stable_mosaic.version = 11 : i64} {
  func.func @mlp_kernel(%arg0: i32, %arg1: memref<128x8xbf16, #tpu.memory_space<vmem>>, %arg2: memref<8x128xbf16, #tpu.memory_space<vmem>>, %arg3: memref<2x128x128xbf16, #tpu.memory_space<vmem>>, %arg4: memref<1x128xf32, #tpu.memory_space<vmem>>) attributes {dimension_semantics = [#tpu.dimension_semantics<parallel>], iteration_bounds = array<i64: 1>, scalar_prefetch = 0 : i64, scratch_operands = 0 : i64, tpu.core_type = #tpu.core_type<tc>, window_params = [{transform_indices = @transform_0, window_bounds = array<i64: 128, 8>}, {pipeline_mode = #tpu.pipeline_mode<synchronous>, transform_indices = @transform_1, window_bounds = array<i64: 8, 128>}, {pipeline_mode = #tpu.pipeline_mode<synchronous>, transform_indices = @transform_2, window_bounds = array<i64: 2, 128, 128>}, {transform_indices = @transform_3, window_bounds = array<i64: 1, 128>}]} {
    %c0 = arith.constant 0 : index
    %c0_0 = arith.constant 0 : index
    %0 = vector.load %arg1[%c0, %c0_0] : memref<128x8xbf16, #tpu.memory_space<vmem>>, vector<128x8xbf16>
    %c0_1 = arith.constant 0 : index
    %c0_2 = arith.constant 0 : index
    %1 = vector.load %arg2[%c0_1, %c0_2] : memref<8x128xbf16, #tpu.memory_space<vmem>>, vector<8x128xbf16>
    %cst = arith.constant dense<0.000000e+00> : vector<128x128xf32>
    %2 = tpu.matmul %0, %1, %cst {dimension_numbers = #tpu.dot_dimension_numbers<[1], [0], [0], [1], [0, 0, 1, 1], [], []>} : vector<128x8xbf16>, vector<8x128xbf16>, vector<128x128xf32> -> vector<128x128xf32>
    %cst_3 = arith.constant 0.000000e+00 : f32
    %3 = vector.broadcast %cst_3 : f32 to vector<128x128xf32>
    %4 = arith.maximumf %2, %3 : vector<128x128xf32>
    %5 = arith.truncf %4 : vector<128x128xf32> to vector<128x128xbf16>
    %c0_4 = arith.constant 0 : index
    %c0_5 = arith.constant 0 : index
    %c0_6 = arith.constant 0 : index
    %6 = vector.load %arg3[%c0_4, %c0_5, %c0_6] : memref<2x128x128xbf16, #tpu.memory_space<vmem>>, vector<1x128x128xbf16>
    %7 = vector.shape_cast %6 : vector<1x128x128xbf16> to vector<128x128xbf16>
    %cst_7 = arith.constant dense<0.000000e+00> : vector<128x128xf32>
    %8 = tpu.matmul %5, %7, %cst_7 {dimension_numbers = #tpu.dot_dimension_numbers<[1], [0], [0], [1], [0, 0, 1, 1], [], []>} : vector<128x128xbf16>, vector<128x128xbf16>, vector<128x128xf32> -> vector<128x128xf32>
    %cst_8 = arith.constant 0.000000e+00 : f32
    %9 = vector.broadcast %cst_8 : f32 to vector<128x128xf32>
    %10 = arith.maximumf %8, %9 : vector<128x128xf32>
    %11 = arith.truncf %10 : vector<128x128xf32> to vector<128x128xbf16>
    %c1 = arith.constant 1 : index
    %c0_9 = arith.constant 0 : index
    %c0_10 = arith.constant 0 : index
    %12 = vector.load %arg3[%c1, %c0_9, %c0_10] : memref<2x128x128xbf16, #tpu.memory_space<vmem>>, vector<1x128x128xbf16>
    %13 = vector.shape_cast %12 : vector<1x128x128xbf16> to vector<128x128xbf16>
    %cst_11 = arith.constant dense<0.000000e+00> : vector<128x128xf32>
    %14 = tpu.matmul %11, %13, %cst_11 {dimension_numbers = #tpu.dot_dimension_numbers<[1], [0], [0], [1], [0, 0, 1, 1], [], []>} : vector<128x128xbf16>, vector<128x128xbf16>, vector<128x128xf32> -> vector<128x128xf32>
    %15 = vector.shape_cast %14 : vector<128x128xf32> to vector<1x128x128xf32>
    %16 = tpu.transpose %15, [0, 2, 1] : vector<1x128x128xf32> -> vector<1x128x128xf32>
    %17 = vector.extract_strided_slice %16 {offsets = [0, 0, 0], sizes = [1, 1, 128], strides = [1, 1, 1]} : vector<1x128x128xf32> to vector<1x1x128xf32>
    %18 = vector.shape_cast %17 : vector<1x1x128xf32> to vector<1x128xf32>
    %cst_12 = arith.constant 0.000000e+00 : f32
    %19 = vector.broadcast %cst_12 : f32 to vector<1x128xf32>
    %20 = arith.subf %19, %18 : vector<1x128xf32>
    %21 = math.exp %20 : vector<1x128xf32>
    %cst_13 = arith.constant 1.000000e+00 : f32
    %22 = vector.broadcast %cst_13 : f32 to vector<1x128xf32>
    %23 = arith.addf %22, %21 : vector<1x128xf32>
    %cst_14 = arith.constant 1.000000e+00 : f32
    %24 = vector.broadcast %cst_14 : f32 to vector<1x128xf32>
    %25 = arith.divf %24, %23 : vector<1x128xf32>
    %c0_15 = arith.constant 0 : index
    %c0_16 = arith.constant 0 : index
    %26 = vector.load %arg4[%c0_15, %c0_16] : memref<1x128xf32, #tpu.memory_space<vmem>>, vector<1x128xf32>
    tpu.vector_store %arg4[%c0_15, %c0_16], %25 {strides = array<i32>} : memref<1x128xf32, #tpu.memory_space<vmem>>, vector<1x128xf32>,
    return
  }
  func.func @transform_0(%arg0: i32) -> (i32, i32) {
    %c0_i32 = arith.constant 0 : i32
    %c0_i32_0 = arith.constant 0 : i32
    return %arg0, %c0_i32 : i32, i32
  }
  func.func @transform_1(%arg0: i32) -> (i32, i32) {
    %c0_i32 = arith.constant 0 : i32
    %c0_i32_0 = arith.constant 0 : i32
    %c0_i32_1 = arith.constant 0 : i32
    return %c0_i32, %c0_i32_0 : i32, i32
  }
  func.func @transform_2(%arg0: i32) -> (i32, i32, i32) {
    %c0_i32 = arith.constant 0 : i32
    %c0_i32_0 = arith.constant 0 : i32
    %c0_i32_1 = arith.constant 0 : i32
    %c0_i32_2 = arith.constant 0 : i32
    return %c0_i32, %c0_i32_0, %c0_i32_1 : i32, i32, i32
  }
  func.func @transform_3(%arg0: i32) -> (i32, i32) {
    %c0_i32 = arith.constant 0 : i32
    %c0_i32_0 = arith.constant 0 : i32
    return %arg0, %c0_i32 : i32, i32
  }
}

</mosaic_0001>

<bundles_post_ra>
// kernel: mlp_forward.1
= control target key start
LH: loop header
LB: loop body
LE: loop exit
PB: predicated region body
PF: predicated region fallthrough
CT: control target
= control target key end

     0   :  { %vm97_vm0 = vcmask 1043456   ;;  %vm72_vm1 = vcmask 64512   ;;  %s918_s1 = inlined_call_operand.vmem [shape: bf16[8,128], index: 1, kind: input, shape index: {}]   ;;  %s919_s0 = inlined_call_operand.vmem [shape: bf16[128,8], index: 0, kind: input, shape index: {}]   ;;  %s920_s2 = inlined_call_operand.vmem [shape: bf16[2,128,128], index: 2, kind: input, shape index: {}]   ;;  %s921_s3 = inlined_call_operand.vmem [shape: f32[1,128], index: 3, kind: output, shape index: {}]  }
   0x1   :  { %v31_v0 = vld [vmem:[%s918_s1] sm:$0xf]  ;;  %v785_v3 = vld [vmem:[%s919_s0 + $0x8] sm:$0xff]   ;;  %v786_v4 = vld [vmem:[%s919_s0 + $0x10] sm:$0xff]  }
   0x2   :  { %783 = vmatprep.subr.msk.bf16.mxu0 %vm97_vm0, %v31_v0  ;;  %v99_v1 = vsel %vm97_vm0, %v31_v0, 0  ;;  %v784_v2 = vld [vmem:[%s919_s0] sm:$0xff]   ;;  %v787_v5 = vld [vmem:[%s919_s0 + $0x18] sm:$0xff]   ;;  %v793_v8 = vld [vmem:[%s920_s2 + $0x30] sm:$0xff]  }
   0x3   :  { %702 = vmatpush3.bf16.msra.mxu0 %v99_v1  ;;  %703 = vmatprep.mubr.msk.bf16.mxu0 %vm72_vm1, %v784_v2  ;;  %v788_v6 = vld [vmem:[%s919_s0 + $0x20] sm:$0xff]   ;;  %v792_v7 = vld [vmem:[%s920_s2 + $0x38] sm:$0xff]   ;;  %v794_v9 = vld [vmem:[%s920_s2 + $0x28] sm:$0xff]  }
   0x4   :  { %719 = vmatprep.subr.bf16.mxu1 %v792_v7  ;;  %v789_v10 = vld [vmem:[%s919_s0 + $0x28] sm:$0xff]   ;;  %v795_v11 = vld [vmem:[%s920_s2 + $0x20] sm:$0xff]   ;;  %v790_v12 = vld [vmem:[%s919_s0 + $0x30] sm:$0xff]  }
   0x5   :  { %720 = vmatpush3.bf16.msra.mxu1 %v792_v7  ;;  %v796_v13 = vld [vmem:[%s920_s2 + $0x18] sm:$0xff]   ;;  %v797_v15 = vld [vmem:[%s920_s2 + $0x10] sm:$0xff]   ;;  %v798_v16 = vld [vmem:[%s920_s2 + $0x8] sm:$0xff]  }
   0x6   :  { %704 = vmatmul.mubr.msk.bf16.vlgmr.msra.gmra.mxu0 %vm72_vm1, %v785_v3  ;;  %721 = vmatprep.subr.bf16.mxu1 %v793_v8  ;;  %v791_v14 = vld [vmem:[%s919_s0 + $0x38] sm:$0xff]   ;;  %v799_v17 = vld [vmem:[%s920_s2] sm:$0xff]   ;;  %v801_v19 = vld [vmem:[%s920_s2 + $0x70] sm:$0xff]  }
   0x7   :  { %707 = vmatprep.mubr.msk.bf16.mxu0 %vm72_vm1, %v786_v4  ;;  %v800_v18 = vld [vmem:[%s920_s2 + $0x78] sm:$0xff]   ;;  %v802_v20 = vld [vmem:[%s920_s2 + $0x68] sm:$0xff]   ;;  %v803_v21 = vld [vmem:[%s920_s2 + $0x60] sm:$0xff]  }
   0x8   :  { %751 = vmatprep.subr.bf16.mxu0 %v800_v18  ;;  %v804_v22 = vld [vmem:[%s920_s2 + $0x58] sm:$0xff]   ;;  %v805_v23 = vld [vmem:[%s920_s2 + $0x50] sm:$0xff]   ;;  %v806_v0 = vld [vmem:[%s920_s2 + $0x48] sm:$0xff]  }
   0x9   :  { %722 = vmatpush3.bf16.msra.mxu1 %v793_v8  ;;  %752 = vmatpush3.bf16.msra.mxu0 %v800_v18  ;;  %v807_v1 = vld [vmem:[%s920_s2 + $0x40] sm:$0xff]  }
   0xa   :  { %723 = vmatprep.subr.bf16.mxu1 %v794_v9  ;;  %753 = vmatprep.subr.bf16.mxu0 %v801_v19 }
   0xd   :  { %724 = vmatpush3.bf16.msra.mxu1 %v794_v9  ;;  %754 = vmatpush3.bf16.msra.mxu0 %v801_v19 }
   0xe   :  { %708 = vmatmul.mubr.msk.bf16.gmra.mxu0 %vm72_vm1, %v787_v5  ;;  %725 = vmatprep.subr.bf16.mxu1 %v795_v11 }
   0xf   :  { %711 = vmatprep.mubr.msk.bf16.mxu0 %vm72_vm1, %v788_v6  ;;  %755 = vmatprep.subr.bf16.mxu0 %v802_v20 }
  0x11   :  { %726 = vmatpush3.bf16.msra.mxu1 %v795_v11  ;;  %756 = vmatpush3.bf16.msra.mxu0 %v802_v20 }
  0x12   :  { %727 = vmatprep.subr.bf16.mxu1 %v796_v13  ;;  %757 = vmatprep.subr.bf16.mxu0 %v803_v21 }
  0x15   :  { %728 = vmatpush3.bf16.msra.mxu1 %v796_v13  ;;  %758 = vmatpush3.bf16.msra.mxu0 %v803_v21 }
  0x16   :  { %712 = vmatmul.mubr.msk.bf16.gmra.mxu0 %vm72_vm1, %v789_v10  ;;  %729 = vmatprep.subr.bf16.mxu1 %v797_v15 }
  0x17   :  { %715 = vmatprep.mubr.msk.bf16.mxu0 %vm72_vm1, %v790_v12  ;;  %759 = vmatprep.subr.bf16.mxu0 %v804_v22 }
  0x19   :  { %730 = vmatpush3.bf16.msra.mxu1 %v797_v15  ;;  %760 = vmatpush3.bf16.msra.mxu0 %v804_v22 }
  0x1a   :  { %731 = vmatprep.subr.bf16.mxu1 %v798_v16  ;;  %761 = vmatprep.subr.bf16.mxu0 %v805_v23 }
  0x1d   :  { %732 = vmatpush3.bf16.msra.mxu1 %v798_v16  ;;  %762 = vmatpush3.bf16.msra.mxu0 %v805_v23 }
  0x1e   :  { %716 = vmatmul.mubr.msk.bf16.gmra.mxu0 %vm72_vm1, %v791_v14  ;;  %733 = vmatprep.subr.bf16.mxu1 %v799_v17 }
  0x1f   :  { %763 = vmatprep.subr.bf16.mxu0 %v806_v0 }
  0x21   :  { %734 = vmatpush3.bf16.msra.mxu1 %v799_v17  ;;  %764 = vmatpush3.bf16.msra.mxu0 %v806_v0 }
  0x22   :  { %765 = vmatprep.subr.bf16.mxu0 %v807_v1 }
  0x25   :  { %766 = vmatpush3.bf16.msra.mxu0 %v807_v1 }
  0xc6   :  { %v705_v24 = vpop.f32.mrf.mxu0 }
  0xc7   :  { %v200_v31 = vmax.f32 %v705_v24, 0.0 }
  0xc8   :  { %v135_v25 = vpop.f32.mrf.mxu0 }
  0xc9   :  { %v198_v29 = vmax.f32 %v135_v25, 0.0 }
  0xca   :  { %v706_v26 = vpop.f32.mrf.mxu0 }
  0xcb   :  { %v201_v27 = vmax.f32 %v706_v26, 0.0 }
  0xcc   :  { %v138_v28 = vpop.f32.mrf.mxu0 }
  0xcd   :  { %v199_v30 = vmax.f32 %v138_v28, 0.0  ;;  %v215_v34 = vpack.c.bf16 %v201_v27, %v200_v31 }
  0xce   :  { %v709_v32 = vpop.f32.mrf.mxu0 }
  0xcf   :  { %v214_v33 = vpack.c.bf16 %v199_v30, %v198_v29  ;;  %v204_v36 = vmax.f32 %v709_v32, 0.0 }
  0xd0   :  { %v151_v35 = vpop.f32.mrf.mxu0 }
  0xd1   :  { %735 = vmatprep.mubr.bf16.mxu1 %v214_v33  ;;  %v202_v38 = vmax.f32 %v151_v35, 0.0 }
  0xd2   :  { %v710_v37 = vpop.f32.mrf.mxu0  ;;  %736 = vmatmul.mubr.bf16.vlgmr.msra.gmra.mxu1 %v215_v34 }
  0xd3   :  { %v205_v39 = vmax.f32 %v710_v37, 0.0 }
  0xd4   :  { %v154_v40 = vpop.f32.mrf.mxu0 }
  0xd5   :  { %v203_v41 = vmax.f32 %v154_v40, 0.0  ;;  %v217_v42 = vpack.c.bf16 %v205_v39, %v204_v36 }
  0xd6   :  { %v713_v43 = vpop.f32.mrf.mxu0 }
  0xd7   :  { %v216_v44 = vpack.c.bf16 %v203_v41, %v202_v38  ;;  %v208_v46 = vmax.f32 %v713_v43, 0.0 }
  0xd8   :  { %v167_v45 = vpop.f32.mrf.mxu0 }
  0xd9   :  { %739 = vmatprep.mubr.bf16.mxu1 %v216_v44  ;;  %v206_v48 = vmax.f32 %v167_v45, 0.0 }
  0xda   :  { %v714_v47 = vpop.f32.mrf.mxu0  ;;  %740 = vmatmul.mubr.bf16.gmra.mxu1 %v217_v42 }
  0xdb   :  { %v209_v49 = vmax.f32 %v714_v47, 0.0 }
  0xdc   :  { %v170_v50 = vpop.f32.mrf.mxu0 }
  0xdd   :  { %v207_v51 = vmax.f32 %v170_v50, 0.0  ;;  %v219_v52 = vpack.c.bf16 %v209_v49, %v208_v46 }
  0xde   :  { %v717_v53 = vpop.f32.mrf.mxu0 }
  0xdf   :  { %v218_v54 = vpack.c.bf16 %v207_v51, %v206_v48  ;;  %v212_v56 = vmax.f32 %v717_v53, 0.0 }
  0xe0   :  { %v183_v55 = vpop.f32.mrf.mxu0 }
  0xe1   :  { %743 = vmatprep.mubr.bf16.mxu1 %v218_v54  ;;  %v210_v58 = vmax.f32 %v183_v55, 0.0 }
  0xe2   :  { %744 = vmatmul.mubr.bf16.gmra.mxu1 %v219_v52  ;;  %v718_v57 = vpop.f32.mrf.mxu0 }
  0xe3   :  { %v213_v59 = vmax.f32 %v718_v57, 0.0 }
  0xe4   :  { %v186_v60 = vpop.f32.mrf.mxu0 }
  0xe5   :  { %v211_v61 = vmax.f32 %v186_v60, 0.0  ;;  %v221_v62 = vpack.c.bf16 %v213_v59, %v212_v56 }
  0xe7   :  { %v220_v63 = vpack.c.bf16 %v211_v61, %v210_v58 }
  0xe9   :  { %747 = vmatprep.mubr.bf16.mxu1 %v220_v63 }
  0xea   :  { %748 = vmatmul.mubr.bf16.gmra.mxu1 %v221_v62 }
 0x192   :  { %v737_v2 = vpop.f32.mrf.mxu1 }
 0x193   :  { %v385_v9 = vmax.f32 %v737_v2, 0.0 }
 0x194   :  { %v320_v3 = vpop.f32.mrf.mxu1 }
 0x195   :  { %v383_v7 = vmax.f32 %v320_v3, 0.0 }
 0x196   :  { %v738_v4 = vpop.f32.mrf.mxu1 }
 0x197   :  { %v386_v5 = vmax.f32 %v738_v4, 0.0 }
 0x198   :  { %v323_v6 = vpop.f32.mrf.mxu1 }
 0x199   :  { %v384_v8 = vmax.f32 %v323_v6, 0.0  ;;  %v400_v12 = vpack.c.bf16 %v386_v5, %v385_v9 }
 0x19a   :  { %v741_v10 = vpop.f32.mrf.mxu1 }
 0x19b   :  { %v399_v11 = vpack.c.bf16 %v384_v8, %v383_v7  ;;  %v389_v19 = vmax.f32 %v741_v10, 0.0 }
 0x19c   :  { %v336_v13 = vpop.f32.mrf.mxu1 }
 0x19d   :  { %767 = vmatprep.mubr.bf16.mxu0 %v399_v11  ;;  %v387_v17 = vmax.f32 %v336_v13, 0.0 }
 0x19e   :  { %v742_v14 = vpop.f32.mrf.mxu1  ;;  %768 = vmatmul.mubr.bf16.vlgmr.msra.gmra.mxu0 %v400_v12 }
 0x19f   :  { %v390_v15 = vmax.f32 %v742_v14, 0.0 }
 0x1a0   :  { %v339_v16 = vpop.f32.mrf.mxu1 }
 0x1a1   :  { %v388_v18 = vmax.f32 %v339_v16, 0.0  ;;  %v402_v22 = vpack.c.bf16 %v390_v15, %v389_v19 }
 0x1a2   :  { %v745_v20 = vpop.f32.mrf.mxu1 }
 0x1a3   :  { %v401_v21 = vpack.c.bf16 %v388_v18, %v387_v17  ;;  %v393_v24 = vmax.f32 %v745_v20, 0.0 }
 0x1a4   :  { %v352_v23 = vpop.f32.mrf.mxu1 }
 0x1a5   :  { %771 = vmatprep.mubr.bf16.mxu0 %v401_v21  ;;  %v391_v26 = vmax.f32 %v352_v23, 0.0 }
 0x1a6   :  { %v746_v25 = vpop.f32.mrf.mxu1  ;;  %772 = vmatmul.mubr.bf16.gmra.mxu0 %v402_v22 }
 0x1a7   :  { %v394_v27 = vmax.f32 %v746_v25, 0.0 }
 0x1a8   :  { %v355_v28 = vpop.f32.mrf.mxu1 }
 0x1a9   :  { %v392_v29 = vmax.f32 %v355_v28, 0.0  ;;  %v404_v30 = vpack.c.bf16 %v394_v27, %v393_v24 }
 0x1aa   :  { %v749_v31 = vpop.f32.mrf.mxu1 }
 0x1ab   :  { %v403_v32 = vpack.c.bf16 %v392_v29, %v391_v26  ;;  %v397_v34 = vmax.f32 %v749_v31, 0.0 }
 0x1ac   :  { %v368_v33 = vpop.f32.mrf.mxu1 }
 0x1ad   :  { %775 = vmatprep.mubr.bf16.mxu0 %v403_v32  ;;  %v395_v36 = vmax.f32 %v368_v33, 0.0 }
 0x1ae   :  { %776 = vmatmul.mubr.bf16.gmra.mxu0 %v404_v30  ;;  %v750_v35 = vpop.f32.mrf.mxu1 }
 0x1af   :  { %v398_v37 = vmax.f32 %v750_v35, 0.0 }
 0x1b0   :  { %v371_v38 = vpop.f32.mrf.mxu1 }
 0x1b1   :  { %v396_v39 = vmax.f32 %v371_v38, 0.0  ;;  %v406_v40 = vpack.c.bf16 %v398_v37, %v397_v34 }
 0x1b3   :  { %v405_v41 = vpack.c.bf16 %v396_v39, %v395_v36 }
 0x1b5   :  { %779 = vmatprep.mubr.bf16.mxu0 %v405_v41 }
 0x1b6   :  { %780 = vmatmul.mubr.bf16.gmra.mxu0 %v406_v40 }
 0x25e   :  { %v769_v42 = vpop.f32.mrf.mxu0 }
 0x260   :  { %v506_v43 = vpop.f32.mrf.mxu0 }
 0x261   :  { %569 = vxpose.xlu0.b32.start [1/16] (narrow) %v506_v43, 8 }
 0x262   :  { %v770_v44 = vpop.f32.mrf.mxu0 }
 0x264   :  { %v509_v45 = vpop.f32.mrf.mxu0 }
 0x265   :  { %570 = vxpose.xlu0.b32.cont [2/16] (narrow) %v509_v45, 8 }
 0x266   :  { %v773_v46 = vpop.f32.mrf.mxu0 }
 0x268   :  { %v522_v47 = vpop.f32.mrf.mxu0 }
 0x269   :  { %571 = vxpose.xlu0.b32.cont [3/16] (narrow) %v769_v42, 8 }
 0x26a   :  { %v774_v48 = vpop.f32.mrf.mxu0 }
 0x26c   :  { %v525_v49 = vpop.f32.mrf.mxu0 }
 0x26d   :  { %572 = vxpose.xlu0.b32.cont [4/16] (narrow) %v770_v44, 8 }
 0x26e   :  { %v777_v50 = vpop.f32.mrf.mxu0 }
 0x270   :  { %v538_v51 = vpop.f32.mrf.mxu0 }
 0x271   :  { %573 = vxpose.xlu0.b32.cont [5/16] (narrow) %v522_v47, 8 }
 0x272   :  { %v778_v52 = vpop.f32.mrf.mxu0 }
 0x274   :  { %v541_v53 = vpop.f32.mrf.mxu0 }
 0x275   :  { %574 = vxpose.xlu0.b32.cont [6/16] (narrow) %v525_v49, 8 }
 0x276   :  { %v781_v54 = vpop.f32.mrf.mxu0 }
 0x278   :  { %v554_v55 = vpop.f32.mrf.mxu0 }
 0x279   :  { %575 = vxpose.xlu0.b32.cont [7/16] (narrow) %v773_v46, 8 }
 0x27a   :  { %v782_v56 = vpop.f32.mrf.mxu0 }
 0x27c   :  { %v557_v57 = vpop.f32.mrf.mxu0 }
 0x27d   :  { %576 = vxpose.xlu0.b32.cont [8/16] (narrow) %v774_v48, 8 }
 0x281   :  { %577 = vxpose.xlu0.b32.cont [9/16] (narrow) %v538_v51, 8 }
 0x285   :  { %578 = vxpose.xlu0.b32.cont [10/16] (narrow) %v541_v53, 8 }
 0x289   :  { %579 = vxpose.xlu0.b32.cont [11/16] (narrow) %v777_v50, 8 }
 0x28d   :  { %580 = vxpose.xlu0.b32.cont [12/16] (narrow) %v778_v52, 8 }
 0x291   :  { %581 = vxpose.xlu0.b32.cont [13/16] (narrow) %v554_v55, 8 }
 0x295   :  { %582 = vxpose.xlu0.b32.cont [14/16] (narrow) %v557_v57, 8 }
 0x299   :  { %583 = vxpose.xlu0.b32.cont [15/16] (narrow) %v781_v54, 8 }
 0x29d   :  { %584 = vxpose.xlu0.b32.end [16/16] (narrow) %v782_v56, 8 }
 0x2dd   :  { %v585_v58 = vpop.trf.xlu0 }
 0x2de   :  { %v601_v59 = vsub.f32 0.0, %v585_v58 }
 0x2e0   :  { %v602_v60 = vmul.f32 1.442695, %v601_v59 }
 0x2e2   :  { %808 = vpow2.f32 %v602_v60 }
 0x2ef   :  { %v809_v61 = vpop.eup %808 }
 0x2f0   :  { %v604_v62 = vadd.f32 1.0, %v809_v61 }
 0x2f2   :  { %810 = vrcp.f32 %v604_v62 }
 0x2ff   :  { %v811_v63 = vpop.eup %810 }
 0x300   :  { %607 = vst [vmem:[%s921_s3] sm:$0x1] %v811_v63 }

</bundles_post_ra>
